<compile_context>
chip_gen: v7x
topology: tpu7x:2x2x1
jax: 0.10.0
libtpu: 0.0.40
codegen_flags: <defaults>
</compile_context>

<pallas_src>
import jax
import jax.numpy as jnp
from jax import lax
from jax.experimental import pallas as pl
from jax.experimental.pallas import tpu as pltpu


def _round_up(x, m):
    return (x + m - 1) // m * m


def _switch_kernel(x_ref, wr_ref, br_ref, w1_ref, b1_ref, w2_ref, b2_ref,
                   out_ref, ids_ref, ids_sc, acc_sc):
    """Grid = (batch tile i, expert e).  Per step: one expert's weight slabs
    are streamed in, applied to the whole batch tile, masked by the routing
    decision and accumulated.

    x_ref  : (tb, D)      f32
    wr_ref : (D, E)       f32       routing weight (pre-transposed)
    br_ref : (1, E)       f32       routing bias
    w1_ref : (1, D, Hp)   f32/bf16  expert-e layer-1 weights
    b1_ref : (1, 1, Hp)   f32       expert-e layer-1 bias
    w2_ref : (1, Hp, Hp)  f32/bf16  expert-e layer-2 weights
    b2_ref : (1, 1, Hp)   f32       expert-e layer-2 bias
    out_ref: (tb, Hp)     f32
    ids_ref: (tb, 128)    i8        expert id broadcast across lanes
    ids_sc : (tb, 1)      i32  VMEM scratch: routing decision for this tile
    acc_sc : (tb, Hp)     f32  VMEM scratch: output accumulator
    """
    e = pl.program_id(1)
    n_e = pl.num_programs(1)

    # ---- routing (fp32, matches torch.amp.autocast(enabled=False)) ----------
    # computed once per batch tile, on the first expert step
    @pl.when(e == 0)
    def _():
        x32 = x_ref[...].astype(jnp.float32)
        logits = jnp.dot(x32, wr_ref[...],
                         preferred_element_type=jnp.float32) + br_ref[...]
        tb, E = logits.shape
        col = lax.broadcasted_iota(jnp.int32, (tb, E), 1)
        maxv = jnp.max(logits, axis=1, keepdims=True)
        # first index achieving the max (torch/jnp argmax tie behavior)
        ids = jnp.min(jnp.where(logits == maxv, col, E), axis=1)       # (tb,)
        ids_sc[...] = ids[:, None]
        ids_ref[...] = jnp.broadcast_to(ids[:, None],
                                        ids_ref.shape).astype(ids_ref.dtype)
        acc_sc[...] = jnp.zeros_like(acc_sc)

    # ---- expert e on the whole tile, masked by the routing decision ---------
    sel = ids_sc[...] == e                                             # (tb, 1)
    xw = x_ref[...].astype(w1_ref.dtype)
    h = jnp.dot(xw, w1_ref[0], preferred_element_type=jnp.float32)     # (tb, Hp)
    # bias + ReLU + top-1 mask + cast fused into a single select so only one
    # copy of the (tb, Hp) intermediate stays live.
    h = jnp.where(sel, jnp.maximum(h + b1_ref[0], 0.0), 0.0).astype(w2_ref.dtype)
    # TODO(synk): nn.Dropout(p=0.2) skipped (identity at eval / inference).
    o = jnp.dot(h, w2_ref[0], preferred_element_type=jnp.float32)      # (tb, Hp)
    acc_sc[...] += o + jnp.where(sel, b2_ref[0], 0.0)

    @pl.when(e == n_e - 1)
    def _():
        out_ref[...] = acc_sc[...].astype(out_ref.dtype)


def pack_params(raw, expert_dtype=jnp.float32):
    """Pad / transpose the torch-layout parameters for the kernel (done once).

    bf16 expert weights are a valid perf option on v5e/v6e/v7x alike (full-rate
    bf16 MXU, half the weight HBM/VMEM traffic); routing stays fp32.
    """
    E, H, D = raw["w1"].shape
    Hp = _round_up(max(H, 128), 128)                 # lane-dense hidden dim

    wr_t = raw["wr"].T.astype(jnp.float32)           # (D, E)
    br = raw["br"].reshape(1, E).astype(jnp.float32)

    # layer-1: torch (E, H, D) -> (E, D, Hp)  so  h = x @ w1[e]
    w1 = jnp.transpose(raw["w1"], (0, 2, 1))
    w1 = jnp.pad(w1, ((0, 0), (0, 0), (0, Hp - H))).astype(expert_dtype)
    b1 = jnp.pad(raw["b1"], ((0, 0), (0, Hp - H))).reshape(E, 1, Hp)
    b1 = b1.astype(jnp.float32)

    # layer-2: torch (E, Hout, Hin) -> (E, Hin_p, Hout_p)  so  o = h @ w2[e]
    w2 = jnp.transpose(raw["w2"], (0, 2, 1))
    w2 = jnp.pad(w2, ((0, 0), (0, Hp - H), (0, Hp - H))).astype(expert_dtype)
    b2 = jnp.pad(raw["b2"], ((0, 0), (0, Hp - H))).reshape(E, 1, Hp)
    b2 = b2.astype(jnp.float32)

    return {"wr_t": wr_t, "br": br, "w1": w1, "b1": b1, "w2": w2, "b2": b2,
            "hidden_dim": H, "hidden_pad": Hp}


def _device_vmem_bytes():
    try:
        return int(pltpu.get_tpu_info().vmem_capacity_bytes)
    except Exception:
        return 64 << 20        # conservative fallback: v7x has 64 MiB per TC


def _vmem_needed(tb, D, E, Hp, wbytes):
    """Per-grid-step VMEM footprint (double-buffered blocks + scratch + live h)."""
    lane = 128
    dbl = 2                                      # default block double-buffering
    b = 0
    b += dbl * tb * D * 4                        # x batch tile
    b += dbl * D * _round_up(E, lane) * 4        # routing W (lane-padded)
    b += dbl * 8 * lane * 4                      # routing b
    b += dbl * (D * Hp * wbytes + Hp * 4)        # streamed W1[e] + b1[e]
    b += dbl * (Hp * Hp * wbytes + Hp * 4)       # streamed W2[e] + b2[e]
    b += dbl * (tb * Hp * 4 + tb * lane)         # out f32 + ids int8
    b += tb * lane * 4 + tb * Hp * 4             # scratch: ids + accumulator
    b += tb * Hp * (4 + wbytes)                  # live h intermediate (+ cast)
    return b


def switch_layer_forward(x, packed):
    """x: (B, D). Returns (outputs (B, H) f32, expert_ids (B,) i32)."""
    B, D = x.shape
    E = packed["br"].shape[1]
    H = packed["hidden_dim"]
    Hp = packed["hidden_pad"]
    wbytes = jnp.dtype(packed["w1"].dtype).itemsize

    # ---- batch tile: 128-aligned at large B, >=2 tiles when possible (v7x
    # dual TensorCore), shrunk until the per-tile footprint fits device VMEM.
    cap = max(32 << 20, _device_vmem_bytes() - (8 << 20))
    if B <= 128:
        tb = _round_up(max(B, 8), 8)
    else:
        n_tiles = pl.cdiv(B, 512)
        if n_tiles == 1 and B > 256:
            n_tiles = 2                          # keep both TCs busy on v7x
        tb = _round_up(pl.cdiv(B, n_tiles), 128)
    while tb > 8 and _vmem_needed(tb, D, E, Hp, wbytes) > cap:
        new_tb = max(128, _round_up(tb // 2, 128)) if tb > 128 else max(8, tb // 2)
        if new_tb == tb:
            break
        tb = new_tb

    B_pad = _round_up(B, tb)
    x32 = x.astype(jnp.float32)
    if B_pad != B:
        x32 = jnp.pad(x32, ((0, B_pad - B), (0, 0)))
    grid = (B_pad // tb, E)

    vmem_bytes = int(min(cap, _vmem_needed(tb, D, E, Hp, wbytes) + (4 << 20)))
    flops = 2 * B_pad * (D * E + E * (D * Hp + Hp * Hp))
    bytes_accessed = int(B_pad * D * 4 + D * E * 4
                         + (B_pad // tb) * E * (D * Hp + Hp * Hp) * wbytes
                         + B_pad * (Hp * 4 + 128))

    out, ids = pl.pallas_call(
        _switch_kernel,
        out_shape=(
            jax.ShapeDtypeStruct((B_pad, Hp), jnp.float32),
            jax.ShapeDtypeStruct((B_pad, 128), jnp.int8),
        ),
        grid=grid,
        in_specs=[
            pl.BlockSpec((tb, D), lambda i, e: (i, 0)),         # x batch tile
            pl.BlockSpec((D, E), lambda i, e: (0, 0)),          # routing W
            pl.BlockSpec((1, E), lambda i, e: (0, 0)),          # routing b
            pl.BlockSpec((1, D, Hp), lambda i, e: (e, 0, 0)),   # W1[e] streamed
            pl.BlockSpec((1, 1, Hp), lambda i, e: (e, 0, 0)),   # b1[e]
            pl.BlockSpec((1, Hp, Hp), lambda i, e: (e, 0, 0)),  # W2[e] streamed
            pl.BlockSpec((1, 1, Hp), lambda i, e: (e, 0, 0)),   # b2[e]
        ],
        out_specs=(
            pl.BlockSpec((tb, Hp), lambda i, e: (i, 0)),
            pl.BlockSpec((tb, 128), lambda i, e: (i, 0)),
        ),
        scratch_shapes=[
            pltpu.VMEM((tb, 1), jnp.int32),      # routing decision
            pltpu.VMEM((tb, Hp), jnp.float32),   # output accumulator
        ],
        compiler_params=pltpu.CompilerParams(
            dimension_semantics=("parallel", "arbitrary"),
            vmem_limit_bytes=vmem_bytes),
        cost_estimate=pl.CostEstimate(flops=flops, transcendentals=0,
                                      bytes_accessed=bytes_accessed),
    )(x32, packed["wr_t"], packed["br"], packed["w1"], packed["b1"],
      packed["w2"], packed["b2"])

    return out[:B, :H], ids[:B, 0].astype(jnp.int32)


def init_params(key, input_dim, hidden_dim, num_experts):
    """Deterministic parameter init mirroring SwitchLayer._init_weights()."""
    kr_w, kr_b, k1, k2 = jax.random.split(key, 4)

    # routing_weights: default nn.Linear init U(-1/sqrt(fan_in), 1/sqrt(fan_in))
    bound = 1.0 / (input_dim ** 0.5)
    wr = jax.random.uniform(kr_w, (num_experts, input_dim), jnp.float32, -bound, bound)
    br = jax.random.uniform(kr_b, (num_experts,), jnp.float32, -bound, bound)

    # experts: trunc_normal(std = 0.1 / sqrt(fan_in)) weights, zero biases.
    # (trunc_normal_ cuts at +/-2 absolute, >100 sigma here -> plain normal.)
    s = 0.1
    std1 = s / (input_dim ** 0.5)
    std2 = s / (hidden_dim ** 0.5)
    w1 = std1 * jax.random.normal(k1, (num_experts, hidden_dim, input_dim), jnp.float32)
    w2 = std2 * jax.random.normal(k2, (num_experts, hidden_dim, hidden_dim), jnp.float32)
    b1 = jnp.zeros((num_experts, hidden_dim), jnp.float32)
    b2 = jnp.zeros((num_experts, hidden_dim), jnp.float32)

    return {"wr": wr, "br": br, "w1": w1, "b1": b1, "w2": w2, "b2": b2}


def _reference_forward(x, raw):
    """Plain-JAX reference (torch-layout params) for correctness checking."""
    logits = x @ raw["wr"].T + raw["br"][None, :]
    ids = jnp.argmax(logits, axis=1)
    h = jnp.einsum("bd,ehd->ebh", x, raw["w1"]) + raw["b1"][:, None, :]
    h = jnp.maximum(h, 0.0)
    o = jnp.einsum("ebh,ekh->ebk", h, raw["w2"]) + raw["b2"][:, None, :]
    out = jnp.take_along_axis(o, ids[None, :, None], axis=0)[0]
    return out, ids


if __name__ == "__main__":
    num_experts = 10
    batch, input_dim, hidden_dim = 8, 32, 32

    key = jax.random.PRNGKey(0)
    kx, kp = jax.random.split(key)
    x = jax.random.normal(kx, (batch, input_dim), jnp.float32)
    raw = init_params(kp, input_dim, hidden_dim, num_experts)
    ref_out, ref_ids = _reference_forward(x, raw)

    # f32 expert path (exact semantics of the torch module for f32 inputs).
    packed_f32 = pack_params(raw, expert_dtype=jnp.float32)
    out, ids = switch_layer_forward(x, packed_f32)
    jax.block_until_ready((out, ids))
    assert out.shape == (batch, hidden_dim) and ids.shape == (batch,)
    assert jnp.array_equal(ids, ref_ids.astype(ids.dtype))
    assert jnp.allclose(out, ref_out, atol=1e-5, rtol=1e-5)

    # bf16 expert path (perf option on v5e/v6e/v7x): routing fp32, ids identical.
    packed_bf16 = pack_params(raw, expert_dtype=jnp.bfloat16)
    out_bf, ids_bf = switch_layer_forward(x, packed_bf16)
    jax.block_until_ready((out_bf, ids_bf))
    assert jnp.array_equal(ids_bf, ref_ids.astype(ids_bf.dtype))
    assert jnp.allclose(out_bf, ref_out, atol=2e-2, rtol=2e-2)

    print("KERNEL_OK")
</pallas_src>

<mosaic_0001>
module attributes {stable_mosaic.version = 11 : i64} {
  func.func @_switch_kernel(%arg0: i32, %arg1: i32, %arg2: memref<8x32xf32, #tpu.memory_space<vmem>>, %arg3: memref<32x10xf32, #tpu.memory_space<vmem>>, %arg4: memref<1x10xf32, #tpu.memory_space<vmem>>, %arg5: memref<1x32x128xf32, #tpu.memory_space<vmem>>, %arg6: memref<1x1x128xf32, #tpu.memory_space<vmem>>, %arg7: memref<1x128x128xf32, #tpu.memory_space<vmem>>, %arg8: memref<1x1x128xf32, #tpu.memory_space<vmem>>, %arg9: memref<8x128xf32, #tpu.memory_space<vmem>>, %arg10: memref<8x128xi8, #tpu.memory_space<vmem>>, %arg11: memref<8x1xi32, #tpu.memory_space<vmem>>, %arg12: memref<8x128xf32, #tpu.memory_space<vmem>>) attributes {dimension_semantics = [#tpu.dimension_semantics<parallel>, #tpu.dimension_semantics<arbitrary>], iteration_bounds = array<i64: 1, 10>, scalar_prefetch = 0 : i64, scratch_operands = 2 : i64, tpu.core_type = #tpu.core_type<tc>, window_params = [{transform_indices = @transform_0, window_bounds = array<i64: 8, 32>}, {pipeline_mode = #tpu.pipeline_mode<synchronous>, transform_indices = @transform_1, window_bounds = array<i64: 32, 10>}, {pipeline_mode = #tpu.pipeline_mode<synchronous>, transform_indices = @transform_2, window_bounds = array<i64: 1, 10>}, {transform_indices = @transform_3, window_bounds = array<i64: 1, 32, 128>}, {transform_indices = @transform_4, window_bounds = array<i64: 1, 1, 128>}, {transform_indices = @transform_5, window_bounds = array<i64: 1, 128, 128>}, {transform_indices = @transform_6, window_bounds = array<i64: 1, 1, 128>}, {transform_indices = @transform_7, window_bounds = array<i64: 8, 128>}, {transform_indices = @transform_8, window_bounds = array<i64: 8, 128>}]} {
    %c0_i32 = arith.constant 0 : i32
    %0 = arith.cmpi eq, %arg1, %c0_i32 : i32
    %1 = arith.extui %0 : i1 to i32
    %c0_i32_0 = arith.constant 0 : i32
    %2 = arith.cmpi ne, %1, %c0_i32_0 : i32
    scf.if %2 {
      %c0_25 = arith.constant 0 : index
      %c0_26 = arith.constant 0 : index
      %38 = vector.load %arg2[%c0_25, %c0_26] : memref<8x32xf32, #tpu.memory_space<vmem>>, vector<8x32xf32>
      %c0_27 = arith.constant 0 : index
      %c0_28 = arith.constant 0 : index
      %39 = vector.load %arg3[%c0_27, %c0_28] : memref<32x10xf32, #tpu.memory_space<vmem>>, vector<32x10xf32>
      %cst_29 = arith.constant dense<0.000000e+00> : vector<8x10xf32>
      %40 = tpu.matmul %38, %39, %cst_29 {dimension_numbers = #tpu.dot_dimension_numbers<[1], [0], [0], [1], [0, 0, 1, 1], [], []>} : vector<8x32xf32>, vector<32x10xf32>, vector<8x10xf32> -> vector<8x10xf32>
      %c0_30 = arith.constant 0 : index
      %c0_31 = arith.constant 0 : index
      %41 = vector.load %arg4[%c0_30, %c0_31] : memref<1x10xf32, #tpu.memory_space<vmem>>, vector<1x10xf32>
      %42 = vector.broadcast %41 : vector<1x10xf32> to vector<8x10xf32>
      %43 = arith.addf %40, %42 : vector<8x10xf32>
      %44 = tpu.iota {dimensions = array<i32: 1>} : vector<8x10xi32>
      %cst_32 = arith.constant dense<0xFF800000> : vector<8xf32>
      %45 = vector.multi_reduction <maximumf>, %43, %cst_32 [1] : vector<8x10xf32> to vector<8xf32>
      %46 = vector.shape_cast %45 : vector<8xf32> to vector<8x1xf32>
      %47 = vector.broadcast %46 : vector<8x1xf32> to vector<8x10xf32>
      %48 = arith.cmpf oeq, %43, %47 : vector<8x10xf32>
      %c10_i32 = arith.constant 10 : i32
      %49 = vector.broadcast %c10_i32 : i32 to vector<8x10xi32>
      %50 = arith.select %48, %44, %49 : vector<8x10xi1>, vector<8x10xi32>
      %cst_33 = arith.constant dense<2147483647> : vector<8xi32>
      %51 = vector.multi_reduction <minsi>, %50, %cst_33 [1] : vector<8x10xi32> to vector<8xi32>
      %52 = vector.shape_cast %51 : vector<8xi32> to vector<8x1xi32>
      %c0_34 = arith.constant 0 : index
      %c0_35 = arith.constant 0 : index
      %53 = vector.load %arg11[%c0_34, %c0_35] : memref<8x1xi32, #tpu.memory_space<vmem>>, vector<8x1xi32>
      tpu.vector_store %arg11[%c0_34, %c0_35], %52 {strides = array<i32>} : memref<8x1xi32, #tpu.memory_space<vmem>>, vector<8x1xi32>,
      %54 = vector.shape_cast %51 : vector<8xi32> to vector<8x1xi32>
      %55 = vector.shape_cast %54 : vector<8x1xi32> to vector<8x1xi32>
      %56 = vector.broadcast %55 : vector<8x1xi32> to vector<8x128xi32>
      %57 = arith.trunci %56 : vector<8x128xi32> to vector<8x128xi8>
      %c0_36 = arith.constant 0 : index
      %c0_37 = arith.constant 0 : index
      %58 = vector.load %arg10[%c0_36, %c0_37] : memref<8x128xi8, #tpu.memory_space<vmem>>, vector<8x128xi8>
      tpu.vector_store %arg10[%c0_36, %c0_37], %57 {strides = array<i32>} : memref<8x128xi8, #tpu.memory_space<vmem>>, vector<8x128xi8>,
      %cst_38 = arith.constant 0.000000e+00 : f32
      %59 = vector.broadcast %cst_38 : f32 to vector<8x128xf32>
      %c0_39 = arith.constant 0 : index
      %c0_40 = arith.constant 0 : index
      %60 = vector.load %arg12[%c0_39, %c0_40] : memref<8x128xf32, #tpu.memory_space<vmem>>, vector<8x128xf32>
      tpu.vector_store %arg12[%c0_39, %c0_40], %59 {strides = array<i32>} : memref<8x128xf32, #tpu.memory_space<vmem>>, vector<8x128xf32>,
    } else {
    }
    %c0 = arith.constant 0 : index
    %c0_1 = arith.constant 0 : index
    %3 = vector.load %arg11[%c0, %c0_1] : memref<8x1xi32, #tpu.memory_space<vmem>>, vector<8x1xi32>
    %4 = vector.broadcast %arg1 : i32 to vector<8x1xi32>
    %5 = arith.cmpi eq, %3, %4 : vector<8x1xi32>
    %c0_2 = arith.constant 0 : index
    %c0_3 = arith.constant 0 : index
    %6 = vector.load %arg2[%c0_2, %c0_3] : memref<8x32xf32, #tpu.memory_space<vmem>>, vector<8x32xf32>
    %c0_4 = arith.constant 0 : index
    %c0_5 = arith.constant 0 : index
    %c0_6 = arith.constant 0 : index
    %7 = vector.load %arg5[%c0_4, %c0_5, %c0_6] : memref<1x32x128xf32, #tpu.memory_space<vmem>>, vector<1x32x128xf32>
    %8 = vector.shape_cast %7 : vector<1x32x128xf32> to vector<32x128xf32>
    %cst = arith.constant dense<0.000000e+00> : vector<8x128xf32>
    %9 = tpu.matmul %6, %8, %cst {dimension_numbers = #tpu.dot_dimension_numbers<[1], [0], [0], [1], [0, 0, 1, 1], [], []>} : vector<8x32xf32>, vector<32x128xf32>, vector<8x128xf32> -> vector<8x128xf32>
    %c0_7 = arith.constant 0 : index
    %c0_8 = arith.constant 0 : index
    %c0_9 = arith.constant 0 : index
    %10 = vector.load %arg6[%c0_7, %c0_8, %c0_9] : memref<1x1x128xf32, #tpu.memory_space<vmem>>, vector<1x1x128xf32>
    %11 = vector.shape_cast %10 : vector<1x1x128xf32> to vector<1x128xf32>
    %12 = vector.broadcast %11 : vector<1x128xf32> to vector<8x128xf32>
    %13 = arith.addf %9, %12 : vector<8x128xf32>
    %cst_10 = arith.constant 0.000000e+00 : f32
    %14 = vector.broadcast %cst_10 : f32 to vector<8x128xf32>
    %15 = arith.maximumf %13, %14 : vector<8x128xf32>
    %cst_11 = arith.constant 0.000000e+00 : f32
    %16 = vector.shape_cast %5 : vector<8x1xi1> to vector<8x1xi1>
    %17 = vector.broadcast %16 : vector<8x1xi1> to vector<8x128xi1>
    %18 = vector.broadcast %cst_11 : f32 to vector<8x128xf32>
    %19 = arith.select %17, %15, %18 : vector<8x128xi1>, vector<8x128xf32>
    %c0_12 = arith.constant 0 : index
    %c0_13 = arith.constant 0 : index
    %c0_14 = arith.constant 0 : index
    %20 = vector.load %arg7[%c0_12, %c0_13, %c0_14] : memref<1x128x128xf32, #tpu.memory_space<vmem>>, vector<1x128x128xf32>
    %21 = vector.shape_cast %20 : vector<1x128x128xf32> to vector<128x128xf32>
    %cst_15 = arith.constant dense<0.000000e+00> : vector<8x128xf32>
    %22 = tpu.matmul %19, %21, %cst_15 {dimension_numbers = #tpu.dot_dimension_numbers<[1], [0], [0], [1], [0, 0, 1, 1], [], []>} : vector<8x128xf32>, vector<128x128xf32>, vector<8x128xf32> -> vector<8x128xf32>
    %c0_16 = arith.constant 0 : index
    %c0_17 = arith.constant 0 : index
    %23 = vector.load %arg12[%c0_16, %c0_17] : memref<8x128xf32, #tpu.memory_space<vmem>>, vector<8x128xf32>
    %c0_18 = arith.constant 0 : index
    %c0_19 = arith.constant 0 : index
    %c0_20 = arith.constant 0 : index
    %24 = vector.load %arg8[%c0_18, %c0_19, %c0_20] : memref<1x1x128xf32, #tpu.memory_space<vmem>>, vector<1x1x128xf32>
    %25 = vector.shape_cast %24 : vector<1x1x128xf32> to vector<1x128xf32>
    %cst_21 = arith.constant 0.000000e+00 : f32
    %26 = vector.shape_cast %5 : vector<8x1xi1> to vector<8x1xi1>
    %27 = vector.broadcast %26 : vector<8x1xi1> to vector<8x128xi1>
    %28 = vector.shape_cast %25 : vector<1x128xf32> to vector<1x128xf32>
    %29 = vector.broadcast %28 : vector<1x128xf32> to vector<8x128xf32>
    %30 = vector.broadcast %cst_21 : f32 to vector<8x128xf32>
    %31 = arith.select %27, %29, %30 : vector<8x128xi1>, vector<8x128xf32>
    %32 = arith.addf %22, %31 : vector<8x128xf32>
    %33 = arith.addf %23, %32 : vector<8x128xf32>
    %c0_22 = arith.constant 0 : index
    %c0_23 = arith.constant 0 : index
    %34 = vector.load %arg12[%c0_22, %c0_23] : memref<8x128xf32, #tpu.memory_space<vmem>>, vector<8x128xf32>
    tpu.vector_store %arg12[%c0_22, %c0_23], %33 {strides = array<i32>} : memref<8x128xf32, #tpu.memory_space<vmem>>, vector<8x128xf32>,
    %c9_i32 = arith.constant 9 : i32
    %35 = arith.cmpi eq, %arg1, %c9_i32 : i32
    %36 = arith.extui %35 : i1 to i32
    %c0_i32_24 = arith.constant 0 : i32
    %37 = arith.cmpi ne, %36, %c0_i32_24 : i32
    scf.if %37 {
      %c0_25 = arith.constant 0 : index
      %c0_26 = arith.constant 0 : index
      %38 = vector.load %arg12[%c0_25, %c0_26] : memref<8x128xf32, #tpu.memory_space<vmem>>, vector<8x128xf32>
      %c0_27 = arith.constant 0 : index
      %c0_28 = arith.constant 0 : index
      %39 = vector.load %arg9[%c0_27, %c0_28] : memref<8x128xf32, #tpu.memory_space<vmem>>, vector<8x128xf32>
      tpu.vector_store %arg9[%c0_27, %c0_28], %38 {strides = array<i32>} : memref<8x128xf32, #tpu.memory_space<vmem>>, vector<8x128xf32>,
    } else {
    }
    return
  }
  func.func @transform_0(%arg0: i32, %arg1: i32) -> (i32, i32) {
    %c0_i32 = arith.constant 0 : i32
    %c0_i32_0 = arith.constant 0 : i32
    return %arg0, %c0_i32 : i32, i32
  }
  func.func @transform_1(%arg0: i32, %arg1: i32) -> (i32, i32) {
    %c0_i32 = arith.constant 0 : i32
    %c0_i32_0 = arith.constant 0 : i32
    %c0_i32_1 = arith.constant 0 : i32
    return %c0_i32, %c0_i32_0 : i32, i32
  }
  func.func @transform_2(%arg0: i32, %arg1: i32) -> (i32, i32) {
    %c0_i32 = arith.constant 0 : i32
    %c0_i32_0 = arith.constant 0 : i32
    %c0_i32_1 = arith.constant 0 : i32
    return %c0_i32, %c0_i32_0 : i32, i32
  }
  func.func @transform_3(%arg0: i32, %arg1: i32) -> (i32, i32, i32) {
    %c0_i32 = arith.constant 0 : i32
    %c0_i32_0 = arith.constant 0 : i32
    %c0_i32_1 = arith.constant 0 : i32
    return %arg1, %c0_i32, %c0_i32_0 : i32, i32, i32
  }
  func.func @transform_4(%arg0: i32, %arg1: i32) -> (i32, i32, i32) {
    %c0_i32 = arith.constant 0 : i32
    %c0_i32_0 = arith.constant 0 : i32
    %c0_i32_1 = arith.constant 0 : i32
    return %arg1, %c0_i32, %c0_i32_0 : i32, i32, i32
  }
  func.func @transform_5(%arg0: i32, %arg1: i32) -> (i32, i32, i32) {
    %c0_i32 = arith.constant 0 : i32
    %c0_i32_0 = arith.constant 0 : i32
    %c0_i32_1 = arith.constant 0 : i32
    return %arg1, %c0_i32, %c0_i32_0 : i32, i32, i32
  }
  func.func @transform_6(%arg0: i32, %arg1: i32) -> (i32, i32, i32) {
    %c0_i32 = arith.constant 0 : i32
    %c0_i32_0 = arith.constant 0 : i32
    %c0_i32_1 = arith.constant 0 : i32
    return %arg1, %c0_i32, %c0_i32_0 : i32, i32, i32
  }
  func.func @transform_7(%arg0: i32, %arg1: i32) -> (i32, i32) {
    %c0_i32 = arith.constant 0 : i32
    %c0_i32_0 = arith.constant 0 : i32
    return %arg0, %c0_i32 : i32, i32
  }
  func.func @transform_8(%arg0: i32, %arg1: i32) -> (i32, i32) {
    %c0_i32 = arith.constant 0 : i32
    %c0_i32_0 = arith.constant 0 : i32
    return %arg0, %c0_i32 : i32, i32
  }
}

</mosaic_0001>

<bundles_post_ra>
// kernel: tpu_custom_call.1
= control target key start
LH: loop header
LB: loop body
LE: loop exit
PB: predicated region body
PF: predicated region fallthrough
CT: control target
= control target key end

     0   :  { %s1659_s0 = inlined_call_operand.vmem [shape: f32[8,32], index: 0, kind: input, shape index: {}]   ;;  %s1660_s1 = inlined_call_operand.vmem [shape: f32[32,10], index: 1, kind: input, shape index: {}]   ;;  %s1661_s2 = inlined_call_operand.vmem [shape: f32[1,10], index: 2, kind: input, shape index: {}]   ;;  %s1662_s3 = inlined_call_operand.hbm [shape: f32[10,32,128], index: 3, kind: input, shape index: {}]   ;;  %s1663_s4 = inlined_call_operand.vmem [shape: f32[10,1,128], index: 4, kind: input, shape index: {}]   ;;  %s1664_s5 = inlined_call_operand.hbm [shape: f32[10,128,128], index: 5, kind: input, shape index: {}]   ;;  %s1665_s6 = inlined_call_operand.vmem [shape: f32[10,1,128], index: 6, kind: input, shape index: {}]   ;;  %s1666_s7 = inlined_call_operand.hbm [shape: f32[8,128], index: 7, kind: output, shape index: {0}]   ;;  %s1667_s8 = inlined_call_operand.hbm [shape: s8[8,128], index: 8, kind: output, shape index: {1}]  }
   0x1   :  { %1670 = sst [smem:[#allocation16_spill]] %s1662_s3 }
   0x2   :  { %14 = vsyncpa [#allocation5], 0 }
   0x3   :  { %16 = vsyncpa [#allocation5 + $0x1], 0 }
   0x4   :  { %17 = vsyncpa [#allocation8], 0 }
   0x5   :  { %19 = vsyncpa [#allocation8 + $0x1], 0 }
   0x6   :  { %20 = vsyncpa [#allocation6], 0 }
   0x7   :  { %21 = vsyncpa [#allocation11], 0  ;;  %s1355_s27 = smov 0   ;;  %s1357_s28 = smov 0  }
   0x8   :  { %s1359_s29 = smov 0   ;;  %s1361_s30 = smov 0  }
   0x9   :  { %s1363_s9 = smov 0   ;;  %s1365_s10 = smov 0  }
   0xa LB: > { %s1668_s11 = sadd.s32 4294967295, %s1295_s10   ;;  %s36_s12 = sadd.s32 1, %s1291_s9  ;;  %s1295_s10 = sphi %s1365_s10, %s27_s10   ;;  %s1291_s9 = sphi %s1363_s9, %s1683_s9   ;;  %s1287_s30 = sphi %s1361_s30, %s1682_s30   ;;  %s1283_s29 = sphi %s1359_s29, %s1681_s29   ;;  %s1279_s28 = sphi %s1357_s28, %s1680_s28   ;;  %s1275_s27 = sphi %s1355_s27, %s1679_s27  }
   0xb   : > { %p37_p0 = scmp.ge.s32.totalorder %s36_s12, 10  ;;  %s114_s13 = sadd.s32 1, %s1283_s29 }
   0xc   : > { %p121_p1 = scmp.ne.s32.totalorder %s1283_s29, %s1279_s28  ;;  %p122_p2 = scmp.eq.s32.totalorder %s1295_s10, 0 }
   0xd   : > { %s1685_s12 = smov (%p37_p0, %s36_s12), 0  ;;  %p127_p4 = scmp.ne.s32.totalorder %s1279_s28, %s1275_s27 }
   0xe   : > { %p1391_p3 = por %p122_p2, %p121_p1  ;;  %s111_s15 = ssub.s32 %s1291_s9, %s1685_s12 }
   0xf   : > { %p128_p5 = scmp.eq.s32.totalorder %s1668_s11, 0  ;;  %p112_p6 = scmp.eq.s32.totalorder %s111_s15, 0 }
  0x10   : > { %p1056_p8 = scmp.lt.s32.totalorder %s1295_s10, 10  ;;  %s1409_s18 = sand.u32 1, %s1283_s29  }
  0x11   : > { %p1400_p7 = por %p128_p5, %p127_p4  ;;  %s915_s19 = sshll.u32 %s1291_s9, 9 }
  0x12   : > { %s1406_s17 = scalar_select %p112_p6, %s1283_s29, %s114_s13  }
  0x13   : > { %s1672_s16 = scalar_select %p1400_p7, 1, 0 }
  0x14   : > { %s892_s20 = sshll.u32 %s1409_s18, 5  ;;  %s1673_s3 = sld [smem:[#allocation16_spill]] }
  0x15   : > { %s298_s24 = scalar_lea.vmem [#allocation4], %s892_s20  ;;  %p1420_p9 = pnand %p1056_p8, %p1391_p3 }
  0x16   : > { %s305_s25 = sshll.u32 %s298_s24, 4  ;;  %s295_s27 = scalar_lea.sflag [#allocation5], %s1409_s18  ;;  %s1424_s25 = int_to_ptr.vmem [resolvable:$true] %s305_s25 }
  0x17   : > { %p1123_p11 = pneg %p1420_p9 }
  0x1a   : > { %s1416_s23 = scalar_lea.hbm %s1673_s3, %s915_s19  ;;  %s1126_s14 = scalar_lea.hbm %s1673_s3, 5120 }
  0x1b   : > { %s1121_s13 = scalar_lea.hbm %s1416_s23, 512  ;;  %p1127_p0 = scmp.lt.u32.totalorder %s1416_s23, %s1673_s3 }
  0x1c   : > { %p1122_p10 = scmp.ne.s32.totalorder %s1416_s23, %s1121_s13  ;;  %p1128_p1 = scmp.lt.u32.totalorder %s1126_s14, %s1121_s13 }
  0x1d   : > { %p1130_p3 = scmp.lt.u32.totalorder %s1121_s13, %s1416_s23 }
  0x1e   : > { %p1124_p12 = pnand %p1123_p11, %p1122_p10  ;;  %p1129_p2 = por %p1128_p1, %p1127_p0 }
  0x20   : > { %p1125_p13 = pneg %p1124_p12  ;;  %p1131_p4 = por %p1130_p3, %p1129_p2 }
  0x22   : > { %p1132_p5 = pnand %p1131_p4, %p1125_p13 }
  0x24   : > { %1135 = shalt.err (!%p1132_p5)
}
  0x25   : > { %s1136_s22 = scalar_lea.vmem %s1424_s25, 512  ;;  %s1297_s24 = smov [#allocation4]  }
  0x26   : > { %p1137_p6 = scmp.ne.s32.totalorder %s1424_s25, %s1136_s22  ;;  %s1141_s15 = sshll.u32 %s1297_s24, 4  ;;  %s1142_s15 = int_to_ptr.vmem [resolvable:$false] %s1141_s15 }
  0x27   : > { %s1143_s19 = scalar_lea.vmem %s1142_s15, 1024  ;;  %p1144_p12 = scmp.lt.s32.totalorder %s1424_s25, %s1142_s15 }
  0x28   : > { %p1139_p8 = pnand %p1137_p6, %p1123_p11  ;;  %p1145_p0 = scmp.lt.s32.totalorder %s1143_s19, %s1136_s22 }
  0x2a   : > { %p1140_p10 = pneg %p1139_p8  ;;  %p1146_p1 = por %p1145_p0, %p1144_p12 }
  0x2c   : > { %p1147_p2 = pnand %p1146_p1, %p1140_p10 }
  0x2e   : > { %1150 = shalt.err (!%p1147_p2)
}
  0x2f   : > { %s1298_s13 = smov 128   ;;  %s1299_s14 = smov 8  }
  0x30   : > { %1052 = dma.hbm_to_vmem [thread:$0]  (!%p1420_p9), %s1416_s23, 512, %s1424_s25, %s295_s27, %s1298_s13, %s1298_s13, %s1299_s14  }
  0x31   : > { %p898_p13 = scmp.ge.s32.totalorder %s1295_s10, 1  ;;  %p346_p3 = scmp.lt.s32.totalorder %s1295_s10, 11 }
  0x32   : > { %s895_s20 = sshll.u32 %s1409_s18, 7  ;;  %s916_s22 = sshll.u32 %s1291_s9, 11 }
  0x33   : > { %p1460_p4 = pnand %p898_p13, %p346_p3  ;;  %s325_s24 = scalar_lea.vmem [#allocation7], %s895_s20 }
  0x34   : > { %s332_s15 = sshll.u32 %s325_s24, 4  ;;  %s1468_s3 = scalar_lea.hbm %s1664_s5, %s916_s22  ;;  %s1470_s15 = int_to_ptr.vmem [resolvable:$true] %s332_s15 }
  0x35   : > { %s322_s23 = scalar_lea.sflag [#allocation8], %s1409_s18  ;;  %s1151_s25 = scalar_lea.hbm %s1468_s3, 2048 }
  0x36   : > { %p1152_p5 = scmp.ne.s32.totalorder %s1468_s3, %s1151_s25  ;;  %s1156_s24 = scalar_lea.hbm %s1664_s5, 20480 }
  0x37   : > { %p1157_p10 = scmp.lt.u32.totalorder %s1468_s3, %s1664_s5  ;;  %p1158_p12 = scmp.lt.u32.totalorder %s1156_s24, %s1151_s25 }
  0x38   : > { %p1154_p6 = pnand %p1152_p5, %p1123_p11  ;;  %p1160_p1 = scmp.lt.u32.totalorder %s1151_s25, %s1468_s3 }
  0x39   : > { %p1159_p0 = por %p1158_p12, %p1157_p10 }
  0x3a   : > { %p1155_p8 = pneg %p1154_p6 }
  0x3b   : > { %p1161_p2 = por %p1160_p1, %p1159_p0 }
  0x3d   : > { %p1162_p13 = pnand %p1161_p2, %p1155_p8 }
  0x3f   : > { %1165 = shalt.err (!%p1162_p13)
}
  0x40   : > { %s1166_s19 = scalar_lea.vmem %s1470_s15, 2048  ;;  %s1300_s27 = smov [#allocation7]  }
  0x41   : > { %p1167_p3 = scmp.ne.s32.totalorder %s1470_s15, %s1166_s19  ;;  %s1171_s20 = sshll.u32 %s1300_s27, 4  ;;  %s1172_s20 = int_to_ptr.vmem [resolvable:$false] %s1171_s20 }
  0x42   : > { %s1173_s11 = scalar_lea.vmem %s1172_s20, 4096  ;;  %p1174_p7 = scmp.lt.s32.totalorder %s1470_s15, %s1172_s20 }
  0x43   : > { %p1169_p5 = pnand %p1167_p3, %p1123_p11  ;;  %p1175_p10 = scmp.lt.s32.totalorder %s1173_s11, %s1166_s19 }
  0x45   : > { %p1170_p6 = pneg %p1169_p5  ;;  %p1176_p12 = por %p1175_p10, %p1174_p7 }
  0x47   : > { %p1177_p0 = pnand %p1176_p12, %p1170_p6 }
  0x49   : > { %1180 = shalt.err (!%p1177_p0)
}
  0x4a   : > { %1055 = dma.hbm_to_vmem [thread:$0]  (!%p1420_p9), %s1468_s3, 2048, %s1470_s15, %s322_s23, %s1298_s13, %s1298_s13, %s1299_s14  }
  0x4b   : > { %350 = sbr.rel (%p1460_p4) target bundleno = 1256 (0x4e8), region = 48  ;;  %s352_s25 = sand.u32 (!%p1460_p4), 1, %s1279_s28  }
  0x4c   : > { %s899_s24 = sshll.u32 (!%p1460_p4), %s352_s25, 5  ;;  %s353_s22 = scalar_lea.sflag (!%p1460_p4), [#allocation5], %s352_s25 }
  0x4d   : > { %s1504_s19 = scalar_lea.vmem (!%p1460_p4), [#allocation4], %s899_s24  ;;  %p1676_p7 = scmp.ne.s32.totalorder (!%p1460_p4), %s1672_s16, 0 }
  0x52   : > { %1258 = dma.done.wait (%p1676_p7), %s353_s22, 512  }
  0x53   : > { %1260 = vsyncadd (%p1676_p7), %s353_s22, 4294966784  ;;  %s900_s18 = sshll.u32 %s352_s25, 7  ;;  %s362_s26 = scalar_lea.sflag [#allocation8], %s352_s25 }
  0x54   : > { %s1510_s27 = scalar_lea.vmem [#allocation7], %s900_s18 }
  0x55   : > { %1262 = dma.done.wait (%p1676_p7), %s362_s26, 2048  }
  0x56   : > { %1264 = vsyncadd (%p1676_p7), %s362_s26, 4294965248  ;;  %p412_p9 = scmp.lt.s32.totalorder %s1287_s30, 9  ;;  %p901_p11 = scmp.ne.s32.totalorder %s1287_s30, 0 }
  0x57   : > { %v423_v0 = vld [vmem:[%s1660_s1] sm:$0xff] (!%p901_p11)  ;;  %v424_v1 = vld [vmem:[%s1660_s1 + $0x8] sm:$0xff] (!%p901_p11)  ;;  %v425_v2 = vld [vmem:[%s1660_s1 + $0x10] sm:$0xff] (!%p901_p11)  ;;  %v1301_v3 = vmov (!%p901_p11), 0.0|0.0   ;;  %vm1302_vm0 = vmmov (!%p901_p11), 0   ;;  %v1303_v6 = vmov (!%p901_p11), 0.0   ;;  %v508_v14 = vlaneseq (!%p901_p11) }
  0x58   : > { %s1518_s3 = scalar_select %p412_p9, %s1287_s30, 9 }
  0x59   : > { %421 = sbr.rel (%p901_p11) target bundleno = 757 (0x2f5), region = 60  ;;  %1001 = vmatprep.subr.bf16.mxu0 (!%p901_p11), %v1301_v3  ;;  %v1002_v4 = vpack.c.bf16 (!%p901_p11), %v424_v1, %v423_v0  ;;  %v426_v5 = vld [vmem:[%s1660_s1 + $0x18] sm:$0xff] (!%p901_p11)  ;;  %952 = vmatprep.mubr.msk.f32.mxu0 (!%p901_p11), %vm1302_vm0, %v1303_v6  ;;  %536 = vst [vmem:[#allocation3] sm:$0xff] (!%p901_p11), %v1303_v6  ;;  %v422_v8 = vld [vmem:[%s1659_s0] sm:$0xff] (!%p901_p11)  ;;  %vm434_vm1 = vcmask (!%p901_p11), 261120   ;;  %vm510_vm2 = vcmask (!%p901_p11), 80896  }
  0x5a   : > { %s414_s21 = scalar_lea.vmem %s1663_s4, %s1518_s3  ;;  %s417_s20 = scalar_lea.vmem %s1665_s6, %s1518_s3  ;;  %v1005_v7 = vpack.c.bf16 (!%p901_p11), %v426_v5, %v425_v2  ;;  %v902_v9 = vld [vmem:[%s1661_s2] ss:$0 sm:$0xff] (!%p901_p11)  ;;  %v509_v15 = vand.u32 (!%p901_p11), 127, %v508_v14  ;;  %vm531_vm5 = vcmask (!%p901_p11), 7168  }
  0x5b   : > { %1003 = vmatpush3.bf16.msra.mxu0 (!%p901_p11), %v1002_v4 }
  0x5c   : > { %1004 = vmatprep.subr.bf16.mxu0 (!%p901_p11), %v1301_v3 }
  0x5f   : > { %1006 = vmatpush3.bf16.msra.mxu0 (!%p901_p11), %v1005_v7 }
  0x62   : > { %953 = vmatmul.mubr.msk.f32.vlgmr.msra.gmra.mrb[0].mxu0 %vm434_vm1, %v422_v8 }
 0x135   : > { %v504_v10 = vpop.f32.mrb[0].mxu0 }
 0x136   : > { %v505_v11 = vadd.f32 %v902_v9, %v504_v10  ;;  %v954_v12 = vpop.f32.mrb[1].mxu0 }
 0x138   : > { %v511_v13 = vsel %vm510_vm2, %v505_v11, -inf }
 0x139   : > { %512 = vmax.xlane.f32.xlu0 %v511_v13 }
 0x1c6   : > { %v513_v16 = vpop.xlane.xlu0 %512 }
 0x1c7   : > { %vm514_vm3 = vcmp.eq.f32.partialorder %v505_v11, %v513_v16 }
 0x1c8   : > { %v515_v17 = vsel %vm514_vm3, %v509_v15, 10 }
 0x1c9   : > { %v516_v18 = vsel %vm510_vm2, %v515_v17, 2147483647 }
 0x1ca   : > { %v518_v19 = vshra.s32 %v516_v18, 16  ;;  %v517_v21 = vand.u32 65535, %v516_v18 }
 0x1cc   : > { %v520_v20 = vcvt.s32.f32 %v518_v19  ;;  %v519_v23 = vcvt.s32.f32 %v517_v21 }
 0x1ce   : > { %521 = vmin.xlane.f32.xlu0 %v520_v20 }
 0x25b   : > { %v522_v22 = vpop.xlane.xlu0 %521 }
 0x25c   : > { %vm523_vm4 = vcmp.eq.f32.partialorder %v520_v20, %v522_v22  ;;  %v528_v25 = vcvt.f32.s32 %v522_v22 }
 0x25d   : > { %v524_v24 = vsel %vm523_vm4, %v519_v23, inf }
 0x25e   : > { %525 = vmin.xlane.f32.xlu1 %v524_v24  ;;  %v529_v27 = vshll.u32 %v528_v25, 16 }
 0x2eb   : > { %v526_v26 = vpop.xlane.xlu1 %525 }
 0x2ec   : > { %v527_v28 = vcvt.f32.s32 %v526_v26 }
 0x2ee   : > { %v530_v29 = vadd.s32 %v529_v27, %v527_v28 }
 0x2f0   : > { %532 = vst.msk [vmem:[#allocation2] sm:$0xff] %vm531_vm5, %v530_v29  ;;  %v533_v30 = vpack.c.b16 %v530_v29, %v530_v29 }
 0x2f2   : > { %v534_v31 = vpack.c.b8 %v533_v30, %v533_v30 }
 0x2f4   : > { %535 = vst [vmem:[#allocation10] sm:$0x3] %v534_v31 }
 0x2f5 PF: > { %v541_v32 = vld [vmem:[%s1504_s19] sm:$0xff]  ;;  %v542_v33 = vld [vmem:[%s1504_s19 + $0x8] sm:$0xff]  ;;  %v543_v34 = vld [vmem:[%s1504_s19 + $0x10] sm:$0xff]  ;;  %v538_v35 = vstv %s1287_s30  ;;  %v1304_v36 = vmov 0.0|0.0   ;;  %vm1305_vm6 = vmmov 0   ;;  %v1306_v39 = vmov 0.0  }
 0x2f6   : > { %1007 = vmatprep.subr.bf16.mxu0 %v1304_v36  ;;  %v1008_v37 = vpack.c.bf16 %v542_v33, %v541_v32  ;;  %v544_v38 = vld [vmem:[%s1504_s19 + $0x18] sm:$0xff]  ;;  %963 = vmatprep.mubr.msk.f32.mxu0 %vm1305_vm6, %v1306_v39  ;;  %v1307_v41 = vmov 0   ;;  %v633_v42 = vld [vmem:[%s1510_s27] sm:$0xff]  ;;  %v634_v43 = vld [vmem:[%s1510_s27 + $0x8] sm:$0xff]  ;;  %vm552_vm8 = vcmask 261120   ;;  %p908_p4 = scmp.ne.s32.totalorder %s1287_s30, 9 }
 0x2f7   : > { %v537_v40 = vld [vmem:[#allocation2] sm:$0xff]  ;;  %1120 = vset.pattern.permute.xlu0 %v1307_v41  ;;  %1013 = vmatprep.subr.bf16.mxu1 %v1304_v36  ;;  %v1011_v45 = vpack.c.bf16 %v544_v38, %v543_v34  ;;  %v1014_v47 = vpack.c.bf16 %v634_v43, %v633_v42  ;;  %v636_v48 = vld [vmem:[%s1510_s27 + $0x18] sm:$0xff]  ;;  %v637_v50 = vld [vmem:[%s1510_s27 + $0x20] sm:$0xff] }
 0x2f8   : > { %vm539_vm7 = vcmp.eq.s32.totalorder %v537_v40, %v538_v35  ;;  %v635_v44 = vld [vmem:[%s1510_s27 + $0x10] sm:$0xff]  ;;  %1009 = vmatpush3.bf16.msra.mxu0 %v1008_v37  ;;  %998 = vmatprep.mubr.msk.f32.mxu1 %vm1305_vm6, %v1306_v39  ;;  %v638_v51 = vld [vmem:[%s1510_s27 + $0x28] sm:$0xff]  ;;  %v640_v55 = vld [vmem:[%s1510_s27 + $0x38] sm:$0xff] }
 0x2f9   : > { %v627_v46 = vsel %vm539_vm7, 1, %v1307_v41  ;;  %1010 = vmatprep.subr.bf16.mxu0 %v1304_v36  ;;  %1015 = vmatpush3.bf16.msra.mxu1 %v1014_v47  ;;  %v1017_v49 = vpack.c.bf16 %v636_v48, %v635_v44  ;;  %v540_v52 = vld [vmem:[%s1659_s0] sm:$0xff]  ;;  %v1020_v53 = vpack.c.bf16 %v638_v51, %v637_v50  ;;  %v641_v57 = vld [vmem:[%s1510_s27 + $0x40] sm:$0xff]  ;;  %v642_v58 = vld [vmem:[%s1510_s27 + $0x48] sm:$0xff] }
 0x2fa   : > { %629 = vperm.xlu0 %1120, %v627_v46   ;;  %1016 = vmatprep.subr.bf16.mxu1 %v1304_v36  ;;  %v639_v54 = vld [vmem:[%s1510_s27 + $0x30] sm:$0xff]  ;;  %v1026_v59 = vpack.c.bf16 %v642_v58, %v641_v57  ;;  %v644_v61 = vld [vmem:[%s1510_s27 + $0x58] sm:$0xff]  ;;  %v645_v63 = vld [vmem:[%s1510_s27 + $0x60] sm:$0xff] }
 0x2fb   : > { %v1023_v56 = vpack.c.bf16 %v640_v55, %v639_v54  ;;  %v643_v60 = vld [vmem:[%s1510_s27 + $0x50] sm:$0xff]  ;;  %v646_v0 = vld [vmem:[%s1510_s27 + $0x68] sm:$0xff]  ;;  %v648_v3 = vld [vmem:[%s1510_s27 + $0x78] sm:$0xff] }
 0x2fc   : > { %1012 = vmatpush3.bf16.msra.mxu0 %v1011_v45  ;;  %v1029_v62 = vpack.c.bf16 %v644_v61, %v643_v60  ;;  %v1032_v1 = vpack.c.bf16 %v646_v0, %v645_v63  ;;  %v647_v2 = vld [vmem:[%s1510_s27 + $0x70] sm:$0xff]  ;;  %v649_v13 = vld [vmem:[#allocation3] sm:$0xff] }
 0x2fd   : > { %1018 = vmatpush3.bf16.msra.mxu1 %v1017_v49  ;;  %v1035_v4 = vpack.c.bf16 %v648_v3, %v647_v2  ;;  %v904_v5 = vld [vmem:[%s414_s21] ss:$0 sm:$0xff] }
 0x2fe   : > { %1019 = vmatprep.subr.bf16.mxu1 %v1304_v36  ;;  %v906_v11 = vld [vmem:[%s417_s20] ss:$0 sm:$0xff] }
 0x2ff   : > { %964 = vmatmul.mubr.msk.f32.vlgmr.msra.gmra.mrb[0].mxu0 %vm552_vm8, %v540_v52 }
 0x301   : > { %1021 = vmatpush3.bf16.msra.mxu1 %v1020_v53 }
 0x302   : > { %1022 = vmatprep.subr.bf16.mxu1 %v1304_v36 }
 0x305   : > { %1024 = vmatpush3.bf16.msra.mxu1 %v1023_v56 }
 0x306   : > { %1025 = vmatprep.subr.bf16.mxu1 %v1304_v36 }
 0x309   : > { %1027 = vmatpush3.bf16.msra.mxu1 %v1026_v59 }
 0x30a   : > { %1028 = vmatprep.subr.bf16.mxu1 %v1304_v36 }
 0x30d   : > { %1030 = vmatpush3.bf16.msra.mxu1 %v1029_v62 }
 0x30e   : > { %1031 = vmatprep.subr.bf16.mxu1 %v1304_v36 }
 0x311   : > { %1033 = vmatpush3.bf16.msra.mxu1 %v1032_v1 }
 0x312   : > { %1034 = vmatprep.subr.bf16.mxu1 %v1304_v36 }
 0x315   : > { %1036 = vmatpush3.bf16.msra.mxu1 %v1035_v4 }
 0x379   : > { %v630_v6 = vpop.permute.xlu0 %629 }
 0x37a   : > { %vm631_vm9 = vcmp.eq.s32.totalorder %v630_v6, 1 }
 0x37b   : > { %v657_v12 = vsel %vm631_vm9, %v906_v11, 0.0 }
 0x3d2   : > { %v622_v7 = vpop.f32.mrb[0].mxu0 }
 0x3d3   : > { %v623_v8 = vadd.f32 %v904_v5, %v622_v7  ;;  %v965_v9 = vpop.f32.mrb[1].mxu0 }
 0x3d5   : > { %v626_v10 = vmax.f32 %v623_v8, 0.0 }
 0x3d7   : > { %999 = vmatmul.mubr.msk.f32.vlgmr.msra.gmra.mrb[0].mxu1 %vm631_vm9, %v626_v10 }
 0x4a9   : > { %733 = sbr.rel (%p908_p4) target bundleno = 1208 (0x4b8), region = 64 }
 0x4aa   : > { %v724_v14 = vpop.f32.mrb[0].mxu1 }
 0x4ab   : > { %v725_v15 = vadd.f32 %v724_v14, %v657_v12  ;;  %v1000_v16 = vpop.f32.mrb[1].mxu1 }
 0x4ad   : > { %v728_v17 = vadd.f32 %v725_v15, %v649_v13 }
 0x4af   : > { %729 = vst [vmem:[#allocation3] sm:$0xff] %v728_v17 }
 0x4b6   : > { %v734_v18 = vld [vmem:[#allocation3] sm:$0xff] }
 0x4b7   : > { %735 = vst [vmem:[#allocation9] sm:$0xff] %v734_v18 }
 0x4b8 PF: > { %s1677_s27 = sadd.s32 4294967295, %s1295_s10   ;;  %s1308_s3 = smov [#allocation9]  }
 0x4b9   : > { %p1586_p8 = scmp.eq.s32.totalorder %s1677_s27, 9  ;;  %s745_s20 = sshll.u32 %s1308_s3, 4  ;;  %s746_s20 = int_to_ptr.vmem [resolvable:$true] %s745_s20 }
 0x4ba   : > { %s1309_s26 = smov [#allocation10]   ;;  %s1181_s14 = scalar_lea.vmem %s746_s20, 128 }
 0x4bb   : > { %s758_s13 = sshll.u32 %s1309_s26, 4  ;;  %p1182_p1 = scmp.ne.s32.totalorder %s746_s20, %s1181_s14  ;;  %s1590_s13 = int_to_ptr.vmem [resolvable:$true] %s758_s13 }
 0x4bc   : > { %p1188_p3 = scmp.lt.s32.totalorder %s746_s20, %s746_s20  ;;  %p1189_p5 = scmp.lt.s32.totalorder %s1181_s14, %s1181_s14 }
 0x4bd   : > { %p1183_p2 = pnand %p1182_p1, %p1586_p8 }
 0x4be   : > { %p1190_p6 = por %p1189_p5, %p1188_p3 }
 0x4bf   : > { %p1184_p13 = pneg %p1183_p2 }
 0x4c1   : > { %p1191_p10 = pnand %p1190_p6, %p1184_p13 }
 0x4c3   : > { %1194 = shalt.err (!%p1191_p10)
}
 0x4c4   : > { %s1195_s23 = scalar_lea.hbm %s1666_s7, 128 }
 0x4c5   : > { %p1196_p12 = scmp.ne.s32.totalorder %s1666_s7, %s1195_s23  ;;  %p1201_p9 = scmp.lt.u32.totalorder %s1195_s23, %s1666_s7 }
 0x4c7   : > { %p1197_p0 = pnand %p1196_p12, %p1586_p8 }
 0x4c9   : > { %p1198_p7 = pneg %p1197_p0 }
 0x4cb   : > { %p1203_p11 = pnand %p1201_p9, %p1198_p7 }
 0x4cd   : > { %1206 = shalt.err (!%p1203_p11)
}
 0x4ce   : > { %1042 = dma.vmem_to_hbm [thread:$0]  (%p1586_p8), %s746_s20, 128, %s1666_s7, [#allocation6]  }
 0x4cf   : > { %s1207_s18 = scalar_lea.vmem %s1590_s13, 32  ;;  %p1214_p13 = scmp.lt.s32.totalorder %s1590_s13, %s1590_s13 }
 0x4d0   : > { %p1208_p4 = scmp.ne.s32.totalorder %s1590_s13, %s1207_s18  ;;  %p1215_p3 = scmp.lt.s32.totalorder %s1207_s18, %s1207_s18 }
 0x4d2   : > { %p1209_p1 = pnand %p1208_p4, %p1586_p8  ;;  %p1216_p5 = por %p1215_p3, %p1214_p13 }
 0x4d4   : > { %p1210_p2 = pneg %p1209_p1 }
 0x4d6   : > { %p1217_p6 = pnand %p1216_p5, %p1210_p2 }
 0x4d8   : > { %1220 = shalt.err (!%p1217_p6)
}
 0x4d9   : > { %s1221_s26 = scalar_lea.hbm %s1667_s8, 32 }
 0x4da   : > { %p1222_p10 = scmp.ne.s32.totalorder %s1667_s8, %s1221_s26  ;;  %p1227_p7 = scmp.lt.u32.totalorder %s1221_s26, %s1667_s8 }
 0x4dc   : > { %p1223_p12 = pnand %p1222_p10, %p1586_p8 }
 0x4de   : > { %p1224_p0 = pneg %p1223_p12 }
 0x4e0   : > { %p1229_p9 = pnand %p1227_p7, %p1224_p0 }
 0x4e2   : > { %1232 = shalt.err (!%p1229_p9)
}
 0x4e3   : > { %1044 = dma.vmem_to_hbm [thread:$0]  (%p1586_p8), %s1590_s13, 32, %s1667_s8, [#allocation11]  }
 0x4e4   : > { %1266 = dma.done.wait (%p1586_p8), [#allocation6], 128  }
 0x4e5   : > { %1268 = vsyncadd (%p1586_p8), [#allocation6], 4294967168 }
 0x4e6   : > { %1270 = dma.done.wait (%p1586_p8), [#allocation11], 32  }
 0x4e7   : > { %1272 = vsyncadd (%p1586_p8), [#allocation11], 4294967264 }
 0x4e8 PF: > { %s27_s10 = sadd.s32 1, %s1295_s10   ;;  %s1679_s27 = smov %s1279_s28 }
 0x4e9   : > { %p24_p11 = scmp.ge.s32.totalorder %s27_s10, 12   ;;  %s1680_s28 = smov %s1283_s29 }
 0x4ea   : > { %s1681_s29 = smov %s1406_s17  ;;  %s1682_s30 = smov %s1291_s9 }
 0x4eb   : > { %s1683_s9 = smov %s1685_s12  ;;  %26 = sbr.rel (!%p24_p11) target bundleno = 10 (0xa), region = 125 }
 0x4f2   :  { %775 = vsyncpa [#allocation5], 1 }
 0x4f3   :  { %777 = vsyncpa [#allocation5 + $0x1], 1 }
 0x4f4   :  { %778 = vsyncpa [#allocation8], 1 }
 0x4f5   :  { %780 = vsyncpa [#allocation8 + $0x1], 1 }
 0x4f6   :  { %781 = vsyncpa [#allocation6], 1 }
 0x4f7   :  { %783 = vsyncpa [#allocation6 + $0x1], 1 }
 0x4f8   :  { %784 = vsyncpa [#allocation11], 1 }

</bundles_post_ra>
